<compile_context>
chip_gen: v5e
topology: v5e:2x2
jax: 0.10.0
libtpu: 0.0.40
codegen_flags: <defaults>
</compile_context>

<pallas_src>
import math

import jax
import jax.numpy as jnp
from jax.experimental import pallas as pl
from jax.experimental.pallas import tpu as pltpu

EMB = 2          # embedding_net output width (fixed by the module: fc1 = Linear(2, n_classes))
EMB_PAD = 8      # narrow lane padding for the embedding weight / accumulator
NC_LANE = 128    # lane-dense output slab width


def _round_up(a, b):
    return (a + b - 1) // b * b


def _make_kernel(D, TK, grid_k):
    """Build the kernel with static knowledge of the K tiling (for edge masking)."""
    rem = D - (grid_k - 1) * TK          # valid columns in the last K tile, 0 < rem <= TK
    need_mask = rem < TK                 # static: only emit mask code if K is ragged

    def kernel(x_ref, we_ref, be_ref, alpha_ref, w1_ref, b1_ref, out_ref, acc_ref):
        # x_ref:     [TM, TK]       f32/bf16  un-padded x tile (edge tiles may hold garbage)
        # we_ref:    [TK, EMB_PAD]  bf16      embedding weight tile (cols >= 2 are zero)
        # be_ref:    [1, EMB_PAD]   f32       embedding bias (padded with zeros)
        # alpha_ref: [1, 1]         f32       PReLU slope (SMEM scalar)
        # w1_ref:    [EMB, NC_PAD]  f32       fc1 weight (cols >= n_classes are zero)
        # b1_ref:    [1, NC_PAD]    f32       fc1 bias (padded cols = -1e30)
        # out_ref:   [TM, NC_PAD]   f32       log-softmax scores (lane-dense slab)
        # acc_ref:   [TM, EMB_PAD]  f32       persistent accumulator across the K axis
        k = pl.program_id(1)

        @pl.when(k == 0)
        def _init():
            acc_ref[...] = jnp.zeros_like(acc_ref)

        def _accumulate(x_tile):
            acc_ref[...] += jnp.dot(x_tile.astype(jnp.bfloat16), we_ref[...],
                                    preferred_element_type=jnp.float32)

        if need_mask:
            is_edge = k == grid_k - 1

            @pl.when(jnp.logical_not(is_edge))
            def _full():
                _accumulate(x_ref[...])

            @pl.when(is_edge)
            def _edge():
                # Zero out-of-bounds columns so garbage (possibly NaN) never reaches acc.
                x = x_ref[...]
                col = jax.lax.broadcasted_iota(jnp.int32, x.shape, 1)
                _accumulate(jnp.where(col < rem, x, jnp.zeros_like(x)))
        else:
            _accumulate(x_ref[...])

        @pl.when(k == grid_k - 1)
        def _epilogue():
            emb = acc_ref[...] + be_ref[...]                    # [TM, EMB_PAD]

            # PReLU with a single shared alpha read from SMEM.
            alpha = alpha_ref[0, 0]
            act = jnp.where(emb >= 0.0, emb, alpha * emb)

            # fc1: Linear(2, n_classes) as a VPU broadcast-MAC (K=2 is wasteful on the MXU).
            logits = (act[:, 0:1] * w1_ref[0:1, :]
                      + act[:, 1:2] * w1_ref[1:2, :]
                      + b1_ref[...])                            # [TM, NC_PAD]

            # Numerically stable log_softmax; padded columns carry -1e30 bias so they
            # contribute nothing to the max / logsumexp.
            m = jnp.max(logits, axis=-1, keepdims=True)
            shifted = logits - m
            lse = jnp.log(jnp.sum(jnp.exp(shifted), axis=-1, keepdims=True))
            out_ref[...] = (shifted - lse).astype(out_ref.dtype)

    return kernel


def build_classification_net(params, in_features, n_classes, *, tm=512, tk=4096):
    """Prepare (pad/cast) parameters once and return a forward(x_nchw) callable."""
    we, be, alpha, w1, b1 = params
    D = int(in_features)
    n_classes = int(n_classes)
    nc_pad = _round_up(max(n_classes, 1), NC_LANE)

    # ---- hardware VMEM cap (v7x: 64 MiB per TensorCore) ---------------------------
    try:
        hw_vmem = int(pltpu.get_tpu_info().vmem_capacity_bytes)
    except Exception:
        hw_vmem = 64 << 20
    vmem_cap = max(hw_vmem - (16 << 20), hw_vmem // 2)

    # ---- K tiling (batch-independent, so weights can be padded exactly once) ------
    x_bytes = 4                      # x streamed as f32 (worst case); cast in-kernel
    tm_max = max(8, _round_up(int(tm), 8))
    D128 = _round_up(D, 128)
    # Budget the double-buffered x tile against ~half the VMEM cap.
    tk_budget = max(128, ((vmem_cap // 2) // (2 * tm_max * x_bytes)) // 128 * 128)
    tk_target = max(128, min(_round_up(int(tk), 128), tk_budget, D128))
    num_k = pl.cdiv(D128, tk_target)
    TK = _round_up(pl.cdiv(D128, num_k), 128)     # multiple of 128, minimal round-up
    grid_k = pl.cdiv(D128, TK)
    K_pad = grid_k * TK

    # ---- one-time parameter padding / casting --------------------------------------
    we_p = jnp.zeros((K_pad, EMB_PAD), jnp.bfloat16).at[:D, :EMB].set(
        jnp.asarray(we, jnp.float32).astype(jnp.bfloat16))
    be_p = jnp.zeros((1, EMB_PAD), jnp.float32).at[:, :EMB].set(
        jnp.asarray(be, jnp.float32).reshape(1, EMB))
    w1_p = jnp.zeros((EMB, nc_pad), jnp.float32).at[:, :n_classes].set(
        jnp.asarray(w1, jnp.float32))
    b1_p = jnp.full((1, nc_pad), -1e30, jnp.float32).at[:, :n_classes].set(
        jnp.asarray(b1, jnp.float32).reshape(1, n_classes))
    alpha_p = jnp.asarray(alpha, jnp.float32).reshape(1, 1)

    kernel = _make_kernel(D, TK, grid_k)

    def forward(x_nchw):
        B = int(x_nchw.shape[0])
        assert int(math.prod(x_nchw.shape[1:])) == D, "input feature size mismatch"

        # Row-major flatten == torch x.view(B, -1); no padding, no dtype copy.
        x_flat = x_nchw.reshape(B, D)
        if x_flat.dtype not in (jnp.float32, jnp.bfloat16):
            x_flat = x_flat.astype(jnp.float32)
        x_itemsize = jnp.dtype(x_flat.dtype).itemsize

        # M tiling: keep >= 2 batch tiles when possible so the "parallel" axis can
        # shard across both TensorCores on v7x (single-TC chips are unaffected).
        B8 = _round_up(B, 8)
        tm_cap = _round_up(pl.cdiv(B8, 2), 8) if B8 >= 16 else B8
        TM = max(8, min(tm_max, tm_cap))
        grid_m = pl.cdiv(B, TM)
        B_out = grid_m * TM            # output padded to full tiles (tiny, sliced below)

        vmem_need = (2 * TM * TK * x_itemsize        # x tiles, double-buffered
                     + 2 * TK * EMB_PAD * 2          # narrow weight tiles (bf16)
                     + 2 * TM * nc_pad * 4           # output tiles
                     + TM * EMB_PAD * 4              # accumulator scratch
                     + 2 * (EMB_PAD + EMB * nc_pad + nc_pad) * 4)
        vmem_limit = int(min(max(int(vmem_need * 1.25) + (2 << 20), 8 << 20), vmem_cap))

        cost = pl.CostEstimate(
            flops=int(2 * B_out * K_pad * EMB_PAD + 8 * B_out * nc_pad),
            transcendentals=int(B_out * nc_pad),
            bytes_accessed=int(B * D * x_itemsize
                               + grid_m * K_pad * EMB_PAD * 2
                               + B_out * nc_pad * 4),
        )

        out_pad = pl.pallas_call(
            kernel,
            out_shape=jax.ShapeDtypeStruct((B_out, nc_pad), jnp.float32),
            grid_spec=pltpu.PrefetchScalarGridSpec(
                num_scalar_prefetch=0,
                grid=(grid_m, grid_k),
                in_specs=[
                    pl.BlockSpec((TM, TK), lambda i, k: (i, k)),          # x (un-padded)
                    pl.BlockSpec((TK, EMB_PAD), lambda i, k: (k, 0)),     # embedding weight
                    pl.BlockSpec((1, EMB_PAD), lambda i, k: (0, 0)),      # embedding bias
                    pl.BlockSpec((1, 1), lambda i, k: (0, 0),             # PReLU alpha
                                 memory_space=pltpu.MemorySpace.SMEM),
                    pl.BlockSpec((EMB, nc_pad), lambda i, k: (0, 0)),     # fc1 weight
                    pl.BlockSpec((1, nc_pad), lambda i, k: (0, 0)),       # fc1 bias
                ],
                out_specs=pl.BlockSpec((TM, nc_pad), lambda i, k: (i, 0)),
                scratch_shapes=[pltpu.VMEM((TM, EMB_PAD), jnp.float32)],
            ),
            compiler_params=pltpu.CompilerParams(
                dimension_semantics=("parallel", "arbitrary"),
                vmem_limit_bytes=vmem_limit,
            ),
            cost_estimate=cost,
        )(x_flat, we_p, be_p, alpha_p, w1_p, b1_p)

        return out_pad[:B, :n_classes]

    return forward


def init_params(key, in_features, n_classes):
    k1, k2, k3, k4 = jax.random.split(key, 4)
    # synthetic embedding_net: Linear(in_features, 2)
    we = jax.random.normal(k1, (in_features, EMB), jnp.float32) * 0.02
    be = jax.random.normal(k2, (1, EMB), jnp.float32) * 0.02
    # PReLU single alpha, torch default init = 0.25
    alpha = jnp.full((1, 1), 0.25, jnp.float32)
    # fc1: Linear(2, n_classes); stored as [2, n_classes] (transposed vs torch weight)
    w1 = jax.random.normal(k3, (EMB, n_classes), jnp.float32) * 0.5
    b1 = jax.random.normal(k4, (1, n_classes), jnp.float32) * 0.1
    return we, be, alpha, w1, b1


def reference_forward(x_nchw, params):
    # Matches the kernel's numerics: bf16 inputs to the first matmul, f32 accumulation.
    we, be, alpha, w1, b1 = params
    B = x_nchw.shape[0]
    x = x_nchw.reshape(B, -1).astype(jnp.bfloat16)
    emb = jnp.dot(x, we.astype(jnp.bfloat16),
                  preferred_element_type=jnp.float32) + be
    act = jnp.where(emb >= 0.0, emb, alpha * emb)
    logits = act @ w1 + b1
    return jax.nn.log_softmax(logits, axis=-1)


if __name__ == "__main__":
    key = jax.random.PRNGKey(0)
    kx, kp, kx2, kp2 = jax.random.split(key, 4)

    # Case 1: nominal shapes (tk=256 exercises a 4-step K-reduction grid; perf default tk=4096).
    B, C, H, W = 2, 4, 16, 16
    n_classes = 8
    x = jax.random.normal(kx, (B, C, H, W), jnp.float32)
    params = init_params(kp, C * H * W, n_classes)
    fwd = build_classification_net(params, C * H * W, n_classes, tm=512, tk=256)
    scores = jax.block_until_ready(fwd(x))
    ref = reference_forward(x, params)
    assert scores.shape == (B, n_classes)
    assert bool(jnp.all(jnp.isfinite(scores)))
    assert jnp.allclose(scores, ref, atol=2e-3, rtol=2e-3), "mismatch vs pure-JAX reference"

    # Case 2: awkward shapes (B=5, D=300, n_classes=3) to exercise the ragged K edge mask
    # and the partial batch tile on the un-padded x path.
    B2, C2, H2, W2 = 5, 3, 10, 10
    n_classes2 = 3
    x2 = jax.random.normal(kx2, (B2, C2, H2, W2), jnp.float32)
    params2 = init_params(kp2, C2 * H2 * W2, n_classes2)
    fwd2 = build_classification_net(params2, C2 * H2 * W2, n_classes2, tm=512, tk=256)
    scores2 = jax.block_until_ready(fwd2(x2))
    ref2 = reference_forward(x2, params2)
    assert scores2.shape == (B2, n_classes2)
    assert bool(jnp.all(jnp.isfinite(scores2)))
    assert jnp.allclose(scores2, ref2, atol=2e-3, rtol=2e-3), "mismatch vs pure-JAX reference"

    print("KERNEL_OK")
</pallas_src>

<mosaic_0001>
module attributes {stable_mosaic.version = 11 : i64} {
  func.func @kernel(%arg0: i32, %arg1: i32, %arg2: memref<8x256xf32, #tpu.memory_space<vmem>>, %arg3: memref<256x8xbf16, #tpu.memory_space<vmem>>, %arg4: memref<1x8xf32, #tpu.memory_space<vmem>>, %arg5: memref<1x1xf32, #tpu.memory_space<smem>>, %arg6: memref<2x128xf32, #tpu.memory_space<vmem>>, %arg7: memref<1x128xf32, #tpu.memory_space<vmem>>, %arg8: memref<8x128xf32, #tpu.memory_space<vmem>>, %arg9: memref<8x8xf32, #tpu.memory_space<vmem>>) attributes {dimension_semantics = [#tpu.dimension_semantics<parallel>, #tpu.dimension_semantics<arbitrary>], iteration_bounds = array<i64: 1, 4>, scalar_prefetch = 0 : i64, scratch_operands = 1 : i64, tpu.core_type = #tpu.core_type<tc>, window_params = [{transform_indices = @transform_0, window_bounds = array<i64: 8, 256>}, {transform_indices = @transform_1, window_bounds = array<i64: 256, 8>}, {pipeline_mode = #tpu.pipeline_mode<synchronous>, transform_indices = @transform_2, window_bounds = array<i64: 1, 8>}, {transform_indices = @transform_3, window_bounds = array<i64: 1, 1>}, {pipeline_mode = #tpu.pipeline_mode<synchronous>, transform_indices = @transform_4, window_bounds = array<i64: 2, 128>}, {pipeline_mode = #tpu.pipeline_mode<synchronous>, transform_indices = @transform_5, window_bounds = array<i64: 1, 128>}, {transform_indices = @transform_6, window_bounds = array<i64: 8, 128>}]} {
    %c0_i32 = arith.constant 0 : i32
    %0 = arith.cmpi eq, %arg1, %c0_i32 : i32
    %1 = arith.extui %0 : i1 to i32
    %c0_i32_0 = arith.constant 0 : i32
    %2 = arith.cmpi ne, %1, %c0_i32_0 : i32
    scf.if %2 {
      %cst_9 = arith.constant 0.000000e+00 : f32
      %13 = vector.broadcast %cst_9 : f32 to vector<8x8xf32>
      %c0_10 = arith.constant 0 : index
      %c0_11 = arith.constant 0 : index
      %14 = vector.load %arg9[%c0_10, %c0_11] : memref<8x8xf32, #tpu.memory_space<vmem>>, vector<8x8xf32>
      tpu.vector_store %arg9[%c0_10, %c0_11], %13 {strides = array<i32>} : memref<8x8xf32, #tpu.memory_space<vmem>>, vector<8x8xf32>,
    } else {
    }
    %c0 = arith.constant 0 : index
    %c0_1 = arith.constant 0 : index
    %3 = vector.load %arg2[%c0, %c0_1] : memref<8x256xf32, #tpu.memory_space<vmem>>, vector<8x256xf32>
    %c0_2 = arith.constant 0 : index
    %c0_3 = arith.constant 0 : index
    %4 = vector.load %arg9[%c0_2, %c0_3] : memref<8x8xf32, #tpu.memory_space<vmem>>, vector<8x8xf32>
    %5 = arith.truncf %3 : vector<8x256xf32> to vector<8x256xbf16>
    %c0_4 = arith.constant 0 : index
    %c0_5 = arith.constant 0 : index
    %6 = vector.load %arg3[%c0_4, %c0_5] : memref<256x8xbf16, #tpu.memory_space<vmem>>, vector<256x8xbf16>
    %cst = arith.constant dense<0.000000e+00> : vector<8x8xf32>
    %7 = tpu.matmul %5, %6, %cst {dimension_numbers = #tpu.dot_dimension_numbers<[1], [0], [0], [1], [0, 0, 1, 1], [], []>} : vector<8x256xbf16>, vector<256x8xbf16>, vector<8x8xf32> -> vector<8x8xf32>
    %8 = arith.addf %4, %7 : vector<8x8xf32>
    %c0_6 = arith.constant 0 : index
    %c0_7 = arith.constant 0 : index
    %9 = vector.load %arg9[%c0_6, %c0_7] : memref<8x8xf32, #tpu.memory_space<vmem>>, vector<8x8xf32>
    tpu.vector_store %arg9[%c0_6, %c0_7], %8 {strides = array<i32>} : memref<8x8xf32, #tpu.memory_space<vmem>>, vector<8x8xf32>,
    %c3_i32 = arith.constant 3 : i32
    %10 = arith.cmpi eq, %arg1, %c3_i32 : i32
    %11 = arith.extui %10 : i1 to i32
    %c0_i32_8 = arith.constant 0 : i32
    %12 = arith.cmpi ne, %11, %c0_i32_8 : i32
    scf.if %12 {
      %c0_9 = arith.constant 0 : index
      %c0_10 = arith.constant 0 : index
      %13 = vector.load %arg9[%c0_9, %c0_10] : memref<8x8xf32, #tpu.memory_space<vmem>>, vector<8x8xf32>
      %c0_11 = arith.constant 0 : index
      %c0_12 = arith.constant 0 : index
      %14 = vector.load %arg4[%c0_11, %c0_12] : memref<1x8xf32, #tpu.memory_space<vmem>>, vector<1x8xf32>
      %15 = vector.broadcast %14 : vector<1x8xf32> to vector<8x8xf32>
      %16 = arith.addf %13, %15 : vector<8x8xf32>
      %c0_13 = arith.constant 0 : index
      %c0_14 = arith.constant 0 : index
      %17 = memref.load %arg5[%c0_13, %c0_14] : memref<1x1xf32, #tpu.memory_space<smem>>
      %cst_15 = arith.constant 0.000000e+00 : f32
      %18 = vector.broadcast %cst_15 : f32 to vector<8x8xf32>
      %19 = arith.cmpf oge, %16, %18 : vector<8x8xf32>
      %20 = vector.broadcast %17 : f32 to vector<8x8xf32>
      %21 = arith.mulf %20, %16 : vector<8x8xf32>
      %22 = arith.select %19, %16, %21 : vector<8x8xi1>, vector<8x8xf32>
      %23 = vector.extract_strided_slice %22 {offsets = [0, 0], sizes = [8, 1], strides = [1, 1]} : vector<8x8xf32> to vector<8x1xf32>
      %c0_16 = arith.constant 0 : index
      %c0_17 = arith.constant 0 : index
      %24 = vector.load %arg6[%c0_16, %c0_17] : memref<2x128xf32, #tpu.memory_space<vmem>>, vector<1x128xf32>
      %25 = vector.broadcast %23 : vector<8x1xf32> to vector<8x128xf32>
      %26 = vector.broadcast %24 : vector<1x128xf32> to vector<8x128xf32>
      %27 = arith.mulf %25, %26 : vector<8x128xf32>
      %28 = vector.extract_strided_slice %22 {offsets = [0, 1], sizes = [8, 1], strides = [1, 1]} : vector<8x8xf32> to vector<8x1xf32>
      %c1 = arith.constant 1 : index
      %c0_18 = arith.constant 0 : index
      %29 = vector.load %arg6[%c1, %c0_18] : memref<2x128xf32, #tpu.memory_space<vmem>>, vector<1x128xf32>
      %30 = vector.broadcast %28 : vector<8x1xf32> to vector<8x128xf32>
      %31 = vector.broadcast %29 : vector<1x128xf32> to vector<8x128xf32>
      %32 = arith.mulf %30, %31 : vector<8x128xf32>
      %33 = arith.addf %27, %32 : vector<8x128xf32>
      %c0_19 = arith.constant 0 : index
      %c0_20 = arith.constant 0 : index
      %34 = vector.load %arg7[%c0_19, %c0_20] : memref<1x128xf32, #tpu.memory_space<vmem>>, vector<1x128xf32>
      %35 = vector.broadcast %34 : vector<1x128xf32> to vector<8x128xf32>
      %36 = arith.addf %33, %35 : vector<8x128xf32>
      %cst_21 = arith.constant dense<0xFF800000> : vector<8xf32>
      %37 = vector.multi_reduction <maximumf>, %36, %cst_21 [1] : vector<8x128xf32> to vector<8xf32>
      %38 = vector.shape_cast %37 : vector<8xf32> to vector<8x1xf32>
      %39 = vector.broadcast %38 : vector<8x1xf32> to vector<8x128xf32>
      %40 = arith.subf %36, %39 : vector<8x128xf32>
      %41 = math.exp %40 : vector<8x128xf32>
      %cst_22 = arith.constant dense<0.000000e+00> : vector<8xf32>
      %42 = vector.multi_reduction <add>, %41, %cst_22 [1] : vector<8x128xf32> to vector<8xf32>
      %43 = vector.shape_cast %42 : vector<8xf32> to vector<8x1xf32>
      %44 = math.log %43 : vector<8x1xf32>
      %45 = vector.broadcast %44 : vector<8x1xf32> to vector<8x128xf32>
      %46 = arith.subf %40, %45 : vector<8x128xf32>
      %c0_23 = arith.constant 0 : index
      %c0_24 = arith.constant 0 : index
      %47 = vector.load %arg8[%c0_23, %c0_24] : memref<8x128xf32, #tpu.memory_space<vmem>>, vector<8x128xf32>
      tpu.vector_store %arg8[%c0_23, %c0_24], %46 {strides = array<i32>} : memref<8x128xf32, #tpu.memory_space<vmem>>, vector<8x128xf32>,
    } else {
    }
    return
  }
  func.func @transform_0(%arg0: i32, %arg1: i32) -> (i32, i32) {
    %c0_i32 = arith.constant 0 : i32
    return %arg0, %arg1 : i32, i32
  }
  func.func @transform_1(%arg0: i32, %arg1: i32) -> (i32, i32) {
    %c0_i32 = arith.constant 0 : i32
    %c0_i32_0 = arith.constant 0 : i32
    return %arg1, %c0_i32 : i32, i32
  }
  func.func @transform_2(%arg0: i32, %arg1: i32) -> (i32, i32) {
    %c0_i32 = arith.constant 0 : i32
    %c0_i32_0 = arith.constant 0 : i32
    %c0_i32_1 = arith.constant 0 : i32
    return %c0_i32, %c0_i32_0 : i32, i32
  }
  func.func @transform_3(%arg0: i32, %arg1: i32) -> (i32, i32) {
    %c0_i32 = arith.constant 0 : i32
    %c0_i32_0 = arith.constant 0 : i32
    %c0_i32_1 = arith.constant 0 : i32
    return %c0_i32, %c0_i32_0 : i32, i32
  }
  func.func @transform_4(%arg0: i32, %arg1: i32) -> (i32, i32) {
    %c0_i32 = arith.constant 0 : i32
    %c0_i32_0 = arith.constant 0 : i32
    %c0_i32_1 = arith.constant 0 : i32
    return %c0_i32, %c0_i32_0 : i32, i32
  }
  func.func @transform_5(%arg0: i32, %arg1: i32) -> (i32, i32) {
    %c0_i32 = arith.constant 0 : i32
    %c0_i32_0 = arith.constant 0 : i32
    %c0_i32_1 = arith.constant 0 : i32
    return %c0_i32, %c0_i32_0 : i32, i32
  }
  func.func @transform_6(%arg0: i32, %arg1: i32) -> (i32, i32) {
    %c0_i32 = arith.constant 0 : i32
    %c0_i32_0 = arith.constant 0 : i32
    return %arg0, %c0_i32 : i32, i32
  }
}

</mosaic_0001>

<bundles_post_ra>
// kernel: tpu_custom_call.1
= control target key start
LH: loop header
LB: loop body
LE: loop exit
PB: predicated region body
PF: predicated region fallthrough
CT: control target
= control target key end

     0   :  { %s1105_s0 = inlined_call_operand.vmem [shape: f32[2,1024], index: 0, kind: input, shape index: {}]   ;;  %s1106_s1 = inlined_call_operand.vmem [shape: bf16[1024,8], index: 1, kind: input, shape index: {}]   ;;  %s1107_s2 = inlined_call_operand.vmem [shape: f32[1,8], index: 2, kind: input, shape index: {}]   ;;  %s1108_s3 = inlined_call_operand.<no memory space> [shape: f32[1,1], index: 3, kind: input, shape index: {}]   ;;  %s1109_s4 = inlined_call_operand.vmem [shape: f32[2,128], index: 4, kind: input, shape index: {}]   ;;  %s1110_s5 = inlined_call_operand.vmem [shape: f32[1,128], index: 5, kind: input, shape index: {}]   ;;  %s1111_s6 = inlined_call_operand.hbm [shape: f32[8,128], index: 6, kind: output, shape index: {}]  }
   0x1   :  { %11 = sst [smem:[#allocation3]] %s1108_s3 }
   0x2   :  { %12 = vsyncpa [#allocation6], 0  ;;  %s1002_s23 = smov 0   ;;  %s1004_s24 = smov 0  }
   0x3   :  { %s1006_s25 = smov 0   ;;  %s1008_s26 = smov 0  }
   0x4   :  { %s1010_s27 = smov 0  }
   0x5 LB: > { %s677_s3 = sadd.s32 4294967295, %s954_s27   ;;  %s27_s28 = sadd.s32 1, %s950_s26  ;;  %s954_s27 = sphi %s1010_s27, %s18_s27   ;;  %s950_s26 = sphi %s1008_s26, %s1115_s26   ;;  %s946_s25 = sphi %s1006_s25, %s1114_s25   ;;  %s942_s24 = sphi %s1004_s24, %s1113_s24   ;;  %s938_s23 = sphi %s1002_s23, %s1112_s23  }
   0x6   : > { %p28_p0 = scmp.ge.s32.totalorder %s27_s28, 4  ;;  %p46_p1 = scmp.ne.s32.totalorder %s942_s24, %s938_s23 }
   0x7   : > { %p47_p2 = scmp.eq.s32.totalorder %s954_s27, 0  ;;  %s39_s30 = sadd.s32 1, %s942_s24 }
   0x8   : > { %s1117_s28 = smov (%p28_p0, %s27_s28), 0  ;;  %p679_p5 = scmp.ge.s32.totalorder %s954_s27, 4 }
   0x9   : > { %p48_p3 = por %p47_p2, %p46_p1  ;;  %s35_s29 = ssub.s32 %s950_s26, %s1117_s28 }
   0xa   : > { %p37_p4 = scmp.eq.s32.totalorder %s35_s29, 0  ;;  %220 = sbr.rel (%p679_p5) target bundleno = 28 (0x1c), region = 32 }
   0xc   : > { %s1038_s7 = scalar_select %p37_p4, %s942_s24, %s39_s30  }
   0xf   : > { %223 = sbr.rel (!%p48_p3) target bundleno = 28 (0x1c), region = 36  ;;  %s225_s8 = sand.u32 (%p48_p3), 1, %s942_s24  }
  0x10   : > { %s759_s9 = sshll.u32 (%p48_p3), %s950_s26, 2  ;;  %s680_s10 = sshll.u32 (%p48_p3), %s225_s8, 4 }
  0x11   : > { %s237_s13 = scalar_lea.vmem (%p48_p3), %s1105_s0, %s759_s9   ;;  %s227_s14 = scalar_lea.vmem (%p48_p3), [#allocation4], %s680_s10  }
  0x12   : > { %s956_s15 = smov (%p48_p3), 0  }
  0x14 LB: >> { %v256_v0 = vld [vmem:[%s237_s13] sm:$0xf]  ;;  %s250_s15 = sadd.s32 1, %s958_s15   ;;  %s958_s15 = sphi %s956_s15, %s250_s15  }
  0x15   : >> { %257 = vst [vmem:[%s227_s14] sm:$0xf] %v256_v0  ;;  %p249_p6 = scmp.ge.s32.totalorder %s250_s15, 1 }
  0x17   : > { %252 = sbr.rel (!%p249_p6) target bundleno = 20 (0x14), region = 125 }
  0x1c PF: > { %p685_p7 = scmp.ge.s32.totalorder %s954_s27, 1  ;;  %p298_p8 = scmp.lt.s32.totalorder %s954_s27, 5 }
  0x1e   : > { %p299_p9 = pnand %p685_p7, %p298_p8 }
  0x1f   : > { %s305_s16 = sand.u32 (!%p299_p9), 1, %s938_s23   ;;  %s687_s17 = sshll.u32 (!%p299_p9), %s946_s25, 5 }
  0x20   : > { %302 = sbr.rel (%p299_p9) target bundleno = 611 (0x263), region = 74  ;;  %s686_s18 = sshll.u32 (!%p299_p9), %s305_s16, 4 }
  0x21   : > { %p340_p10 = scmp.lt.s32.totalorder (!%p299_p9), %s687_s17, 127  ;;  %s307_s29 = scalar_lea.vmem (!%p299_p9), [#allocation4], %s686_s18 }
  0x22   : > { %p689_p11 = scmp.ne.s32.totalorder (!%p299_p9), %s946_s25, 0 }
  0x25   : > { %s1119_s17 = smov (!%p340_p10, %s687_s17), 127  ;;  %348 = sbr.rel (%p689_p11) target bundleno = 44 (0x2c), region = 82 }
  0x26   : > { %s688_s19 = sshll.u32 %s1119_s17, 2 }
  0x27   : > { %s1053_s22 = scalar_lea.vmem %s1106_s1, %s688_s19 }
  0x2a   : > { %vm349_vm0 = vcmask 64512   ;;  %v960_v1 = vmov 0.0  }
  0x2b   : > { %350 = vst.msk [vmem:[#allocation2] sm:$0xff] %vm349_vm0, %v960_v1 }
  0x2c PF: > { %v767_v2 = vld [vmem:[%s1053_s22 + $0x38] sm:$0xff]  ;;  %v766_v4 = vld [vmem:[%s1053_s22 + $0x30] sm:$0xff]  ;;  %v765_v6 = vld [vmem:[%s1053_s22 + $0x28] sm:$0xff]  ;;  %vm528_vm1 = vcmask 64512   ;;  %p754_p12 = scmp.ne.s32.totalorder %s946_s25, 3 }
  0x2d   : > { %v775_v3 = vld [vmem:[%s1053_s22 + $0x78] sm:$0xff]  ;;  %501 = vmatpush.bf16.msra.mxu0 %v767_v2  ;;  %v774_v5 = vld [vmem:[%s1053_s22 + $0x70] sm:$0xff]  ;;  %v773_v7 = vld [vmem:[%s1053_s22 + $0x68] sm:$0xff]  ;;  %s540_s8 = sld [smem:[#allocation3]] (!%p754_p12) }
  0x2e   : > { %514 = vmatpush.bf16.msra.mxu1 %v775_v3  ;;  %v351_v8 = vld [vmem:[%s307_s29] sm:$0xf]  ;;  %v352_v9 = vld [vmem:[%s307_s29 + $0x4] sm:$0xf]  ;;  %v353_v10 = vld [vmem:[%s307_s29 + $0x8] sm:$0xf] }
  0x2f   : > { %v354_v11 = vld [vmem:[%s307_s29 + $0xc] sm:$0xf]  ;;  %360 = vst [vmem:[#allocation1] ss:$4 sm:$0xff] %v351_v8  ;;  %v764_v12 = vld [vmem:[%s1053_s22 + $0x20] sm:$0xff]  ;;  %v762_v16 = vld [vmem:[%s1053_s22 + $0x10] sm:$0xff] }
  0x30   : > { %362 = vst [vmem:[#allocation1 + $0x1] ss:$4 sm:$0xff] %v352_v9  ;;  %v772_v13 = vld [vmem:[%s1053_s22 + $0x60] sm:$0xff]  ;;  %v763_v14 = vld [vmem:[%s1053_s22 + $0x18] sm:$0xff]  ;;  %v770_v17 = vld [vmem:[%s1053_s22 + $0x50] sm:$0xff] }
  0x31   : > { %502 = vmatpush.bf16.msra.mxu0 %v766_v4  ;;  %364 = vst [vmem:[#allocation1 + $0x2] ss:$4 sm:$0xff] %v353_v10  ;;  %v771_v15 = vld [vmem:[%s1053_s22 + $0x58] sm:$0xff]  ;;  %v761_v18 = vld [vmem:[%s1053_s22 + $0x8] sm:$0xff]  ;;  %v760_v20 = vld [vmem:[%s1053_s22] sm:$0xff] }
  0x32   : > { %515 = vmatpush.bf16.msra.mxu1 %v774_v5  ;;  %366 = vst [vmem:[#allocation1 + $0x3] ss:$4 sm:$0xff] %v354_v11  ;;  %v769_v19 = vld [vmem:[%s1053_s22 + $0x48] sm:$0xff]  ;;  %v768_v21 = vld [vmem:[%s1053_s22 + $0x40] sm:$0xff] }
  0x33   : > { %v355_v27 = vld [vmem:[#allocation2] sm:$0xff] }
  0x35   : > { %503 = vmatpush.bf16.msra.mxu0 %v765_v6 }
  0x36   : > { %516 = vmatpush.bf16.msra.mxu1 %v773_v7 }
  0x39   : > { %504 = vmatpush.bf16.msra.mxu0 %v764_v12  ;;  %v367_v22 = vld.sshfl [vmem:[#allocation1] sm:$0xff pattern:$0x73625140]  ;;  %v368_v23 = vld.sshfl [vmem:[#allocation1 + $0x8] sm:$0xff pattern:$0x73625140] }
  0x3a   : > { %517 = vmatpush.bf16.msra.mxu1 %v772_v13  ;;  %v371_v24 = vpack.c.bf16 %v367_v22, %v367_v22  ;;  %v372_v25 = vpack.c.bf16 %v368_v23, %v368_v23 }
  0x3d   : > { %505 = vmatpush.bf16.msra.mxu0 %v763_v14 }
  0x3e   : > { %518 = vmatpush.bf16.msra.mxu1 %v771_v15 }
  0x41   : > { %506 = vmatpush.bf16.msra.mxu0 %v762_v16 }
  0x42   : > { %519 = vmatpush.bf16.msra.mxu1 %v770_v17 }
  0x45   : > { %507 = vmatpush.bf16.msra.mxu0 %v761_v18 }
  0x46   : > { %520 = vmatpush.bf16.msra.mxu1 %v769_v19 }
  0x49   : > { %508 = vmatpush.bf16.msra.mxu0 %v760_v20 }
  0x4a   : > { %521 = vmatpush.bf16.msra.mxu1 %v768_v21 }
  0x4c   : > { %509 = vmatmul.bf16.vlgmr.msra.gmra.mxu0 %v371_v24 }
  0x4d   : > { %522 = vmatmul.bf16.vlgmr.msra.gmra.mxu1 %v372_v25 }
  0xc9   : > { %v510_v26 = vpop.f32.mrf.mxu0 }
  0xca   : > { %v523_v28 = vpop.f32.mrf.mxu1 }
  0xcb   : > { %v524_v29 = vadd.f32 %v523_v28, %v510_v26 }
  0xcd   : > { %v527_v30 = vadd.f32 %v524_v29, %v355_v27 }
  0xce   : > { %533 = sbr.rel (%p754_p12) target bundleno = 605 (0x25d), region = 86 }
  0xcf   : > { %529 = vst.msk [vmem:[#allocation2] sm:$0xff] %vm528_vm1, %v527_v30 }
  0xd1   : > { %v512_v31 = vpop.f32.mrf.mxu0 }
  0xd2   : > { %v525_v32 = vpop.f32.mrf.mxu1 }
  0xd3   : > { %v860_v34 = vld [vmem:[%s1107_s2] ss:$0 sm:$0xff]  ;;  %v961_v35 = vmov 0   ;;  %v542_v37 = vstv %s540_s8  ;;  %v962_v40 = vmov 1   ;;  %v862_v43 = vld [vmem:[%s1109_s4 + $0x1] ss:$0 sm:$0xff] }
  0xd4   : > { %858 = vset.pattern.permute.xlu0 %v961_v35  ;;  %v861_v42 = vld [vmem:[%s1109_s4] ss:$0 sm:$0xff] }
  0xd5   : > { %v863_v47 = vld [vmem:[%s1110_s5] ss:$0 sm:$0xff] }
  0xd6   : > { %v534_v33 = vld [vmem:[#allocation2] sm:$0xff] }
  0xd7   : > { %v539_v36 = vadd.f32 %v860_v34, %v534_v33 }
  0xd9   : > { %vm541_vm2 = vcmp.ge.f32.partialorder %v539_v36, 0.0  ;;  %v543_v38 = vmul.f32 %v542_v37, %v539_v36 }
  0xdb   : > { %v544_v39 = vsel %vm541_vm2, %v539_v36, %v543_v38 }
  0xdc   : > { %548 = vperm.xlu0 %858, %v544_v39  }
  0xe4   : > { %859 = vset.pattern.permute.xlu0 %v962_v40 }
  0xe5   : > { %555 = vperm.xlu0 %859, %v544_v39  }
 0x14e   : > { %v549_v41 = vpop.permute.xlu0 %548 }
 0x14f   : > { %v552_v45 = vmul.f32 %v861_v42, %v549_v41 }
 0x157   : > { %v556_v44 = vpop.permute.xlu0 %555 }
 0x158   : > { %v559_v46 = vmul.f32 %v862_v43, %v556_v44 }
 0x15a   : > { %v560_v48 = vadd.f32 %v559_v46, %v552_v45 }
 0x15c   : > { %v565_v49 = vadd.f32 %v863_v47, %v560_v48 }
 0x15e   : > { %566 = vmax.xlane.f32.xlu1 %v565_v49 }
 0x1d1   : > { %v567_v50 = vpop.xlane.xlu1 %566 }
 0x1d2   : > { %v568_v51 = vsub.f32 %v565_v49, %v567_v50 }
 0x1d4   : > { %v569_v52 = vmul.f32 1.442695, %v568_v51 }
 0x1d6   : > { %864 = vpow2.f32 %v569_v52 }
 0x1dc   : > { %v865_v53 = vpop.eup %864 }
 0x1dd   : > { %571 = vadd.xlane.f32.xlu1 %v865_v53 }
 0x250   : > { %v572_v54 = vpop.xlane.xlu1 %571 }
 0x251   : > { %866 = vlog2.f32 %v572_v54 }
 0x257   : > { %v867_v55 = vpop.eup %866 }
 0x258   : > { %v574_v56 = vmul.f32 0.6931472, %v867_v55 }
 0x25a   : > { %v575_v57 = vsub.f32 %v568_v51, %v574_v56 }
 0x25c   : > { %576 = vst [vmem:[#allocation5] sm:$0xff] %v575_v57 }
 0x25d PF: > { %p780_p13 = scmp.eq.s32.totalorder %s677_s3, 3  ;;  %s587_s16 = sshll.u32 %s1111_s6, 4  ;;  %s588_s16 = int_to_ptr.hbm [resolvable:$true] %s587_s16 }
 0x25e   : > { %s963_s17 = smov [#allocation5]  }
 0x25f   : > { %s585_s18 = sshll.u32 %s963_s17, 4  ;;  %s586_s18 = int_to_ptr.vmem [resolvable:$true] %s585_s18 }
 0x260   : > { %777 = dma.vmem_to_hbm [thread:$0]  (%p780_p13), %s586_s18, 128, %s588_s16, [#allocation6]  }
 0x261   : > { %933 = dma.done.wait (%p780_p13), [#allocation6], 128  }
 0x262   : > { %935 = vsyncadd (%p780_p13), [#allocation6], 4294967168 }
 0x263 PF: > { %s18_s27 = sadd.s32 1, %s954_s27   ;;  %s1112_s23 = smov %s942_s24 }
 0x264   : > { %p15_p0 = scmp.ge.s32.totalorder %s18_s27, 6   ;;  %s1113_s24 = smov %s1038_s7 }
 0x265   : > { %s1114_s25 = smov %s950_s26  ;;  %s1115_s26 = smov %s1117_s28 }
 0x266   :  { %17 = sbr.rel (!%p15_p0) target bundleno = 5 (0x5), region = 136 }
 0x26b   :  { %601 = vsyncpa [#allocation6], 1 }
 0x26c   :  { %603 = vsyncpa [#allocation6 + $0x1], 1 }

</bundles_post_ra>
